<compile_context>
chip_gen: v5e
topology: v5e:2x2
jax: 0.10.0
libtpu: 0.0.40
codegen_flags: <defaults>
</compile_context>

<pallas_src>
import functools

import jax
import jax.numpy as jnp
from jax.experimental import pallas as pl
from jax.experimental.pallas import tpu as pltpu

_LANE = 128
_SMALL_N = 1 << 21   # below ~2M elements, plain jnp (XLA fusion) wins


def _round_up(v: int, m: int) -> int:
    return (v + m - 1) // m * m


def _device_kind() -> str:
    try:
        return jax.devices()[0].device_kind.lower()
    except Exception:
        return ""


def _is_v5e(kind: str) -> bool:
    return ("v5 lite" in kind) or ("v5e" in kind) or ("v5lite" in kind)


def _is_v7(kind: str) -> bool:
    return "v7" in kind


def _elementwise_kernel(x_ref, o_ref, *, compute_dtype):
    # (((x + 2) - 3) * 4 / 5) ** 2  ==  0.64 * (x - 1)^2
    t = x_ref[...].astype(compute_dtype) - 1.0
    o_ref[...] = (0.64 * (t * t)).astype(o_ref.dtype)


def _forward_jnp(x):
    t = x - 1.0
    return 0.64 * t * t


def pt_module_forward(x: jax.Array, *, use_pallas=None) -> jax.Array:
    orig_shape = x.shape

    # torch.div promotes integer inputs to float; floats keep their dtype.
    # TODO(synk): integer inputs are promoted to f32 before the arithmetic, so
    # results diverge from PyTorch for |x| > 2^24 (exact int add/sub/mul there).
    if jnp.issubdtype(x.dtype, jnp.floating):
        out_dtype = x.dtype
    else:
        out_dtype = jnp.float32
    x = x.astype(out_dtype)

    n = x.size
    if use_pallas is None:
        use_pallas = n >= _SMALL_N
    if not use_pallas or n < _LANE:
        return _forward_jnp(x)

    kind = _device_kind()
    itemsize = jnp.dtype(out_dtype).itemsize

    # Compute dtype: keep bf16/fp16 native on v6e/v7x; upcast on v5e / unknown.
    if out_dtype == jnp.float32 or _is_v5e(kind) or not kind:
        compute_dtype = jnp.float32
    else:
        compute_dtype = out_dtype

    # Lane-dense aligned prefix; the <128-element tail (if any) goes to jnp.
    flat = x.reshape(-1)                        # layout-only, no copy
    n_rows = n // _LANE
    n_main = n_rows * _LANE
    tail = n - n_main
    main = flat[: n_main] if tail else flat
    x2d = main.reshape(n_rows, _LANE)

    # Sublane rounding: 8 rows for 32-bit, 16 for bf16/fp16 (packed sublanes).
    sub = 8 * max(1, 4 // itemsize)

    # Generation-aware block size (bytes per block, single-buffered):
    #   v5e / unknown: 2 MiB (8 MiB double-buffered in+out < 16 MiB scoped VMEM)
    #   v6e / v7x:     4 MiB (16 MiB double-buffered < 32 MiB scoped VMEM)
    block_bytes = (2 << 20) if (_is_v5e(kind) or not kind) else (4 << 20)
    block_rows_cap = max(sub, block_bytes // (_LANE * itemsize))

    if n_rows <= block_rows_cap:
        if _is_v7(kind) and n_rows > sub:
            # v7x megacore: ensure >= 2 grid steps so both TensorCores get work.
            block_rows = _round_up(pl.cdiv(n_rows, 2), sub)
        else:
            block_rows = _round_up(n_rows, sub)
    else:
        block_rows = block_rows_cap
    grid = (pl.cdiv(n_rows, block_rows),)

    cost = pl.CostEstimate(
        flops=3 * n_main,
        transcendentals=0,
        bytes_accessed=2 * n_main * itemsize,
    )

    kernel = functools.partial(_elementwise_kernel, compute_dtype=compute_dtype)
    out2d = pl.pallas_call(
        kernel,
        out_shape=jax.ShapeDtypeStruct((n_rows, _LANE), out_dtype),
        grid_spec=pltpu.PrefetchScalarGridSpec(
            num_scalar_prefetch=0,
            grid=grid,
            in_specs=[pl.BlockSpec((block_rows, _LANE), lambda i: (i, 0))],
            out_specs=pl.BlockSpec((block_rows, _LANE), lambda i: (i, 0)),
        ),
        compiler_params=pltpu.CompilerParams(
            # Single independent axis -> shard grid steps across TCs on v7x.
            dimension_semantics=("parallel",),
        ),
        cost_estimate=cost,
    )(x2d)

    out_main = out2d.reshape(-1)
    if tail:
        out_tail = _forward_jnp(flat[n_main:]).astype(out_dtype)
        out = jnp.concatenate([out_main, out_tail])
    else:
        out = out_main
    return out.reshape(orig_shape)


if __name__ == "__main__":
    key = jax.random.PRNGKey(0)

    # Small test shape consistent with an NCHW module input (128-aligned size).
    x = jax.random.normal(key, (2, 4, 16, 16), dtype=jnp.float32)
    y = pt_module_forward(x, use_pallas=True)   # force the Pallas path
    jax.block_until_ready(y)
    ref = jnp.power((x + 2.0 - 3.0) * 4.0 / 5.0, 2)
    assert y.shape == x.shape and y.dtype == x.dtype
    assert jnp.allclose(y, ref, atol=1e-5, rtol=1e-5)

    # Non-128-aligned shape exercises the aligned-prefix + jnp-tail path.
    key2 = jax.random.PRNGKey(1)
    x2 = jax.random.normal(key2, (3, 5, 37, 53), dtype=jnp.float32)
    y2 = pt_module_forward(x2, use_pallas=True)
    jax.block_until_ready(y2)
    ref2 = jnp.power((x2 + 2.0 - 3.0) * 4.0 / 5.0, 2)
    assert y2.shape == x2.shape
    assert jnp.allclose(y2, ref2, atol=1e-5, rtol=1e-5)

    # bf16 path (native compute on v6e/v7x, f32 upcast on v5e).
    x3 = jax.random.normal(jax.random.PRNGKey(2), (2, 4, 16, 16), dtype=jnp.bfloat16)
    y3 = pt_module_forward(x3, use_pallas=True)
    jax.block_until_ready(y3)
    ref3 = jnp.power((x3.astype(jnp.float32) + 2.0 - 3.0) * 4.0 / 5.0, 2)
    assert y3.shape == x3.shape and y3.dtype == x3.dtype
    assert jnp.allclose(y3.astype(jnp.float32), ref3, atol=0.1, rtol=0.05)

    print("KERNEL_OK")
</pallas_src>

<mosaic_0001>
module attributes {stable_mosaic.version = 11 : i64} {
  func.func @_elementwise_kernel(%arg0: i32, %arg1: memref<16x128xf32, #tpu.memory_space<vmem>>, %arg2: memref<16x128xf32, #tpu.memory_space<vmem>>) attributes {dimension_semantics = [#tpu.dimension_semantics<parallel>], iteration_bounds = array<i64: 1>, scalar_prefetch = 0 : i64, scratch_operands = 0 : i64, tpu.core_type = #tpu.core_type<tc>, window_params = [{transform_indices = @transform_0, window_bounds = array<i64: 16, 128>}, {transform_indices = @transform_1, window_bounds = array<i64: 16, 128>}]} {
    %c0 = arith.constant 0 : index
    %c0_0 = arith.constant 0 : index
    %0 = vector.load %arg1[%c0, %c0_0] : memref<16x128xf32, #tpu.memory_space<vmem>>, vector<16x128xf32>
    %cst = arith.constant 1.000000e+00 : f32
    %1 = vector.broadcast %cst : f32 to vector<16x128xf32>
    %2 = arith.subf %0, %1 : vector<16x128xf32>
    %3 = arith.mulf %2, %2 : vector<16x128xf32>
    %cst_1 = arith.constant 6.400000e-01 : f32
    %4 = vector.broadcast %cst_1 : f32 to vector<16x128xf32>
    %5 = arith.mulf %4, %3 : vector<16x128xf32>
    %c0_2 = arith.constant 0 : index
    %c0_3 = arith.constant 0 : index
    %6 = vector.load %arg2[%c0_2, %c0_3] : memref<16x128xf32, #tpu.memory_space<vmem>>, vector<16x128xf32>
    tpu.vector_store %arg2[%c0_2, %c0_3], %5 {strides = array<i32>} : memref<16x128xf32, #tpu.memory_space<vmem>>, vector<16x128xf32>,
    return
  }
  func.func @transform_0(%arg0: i32) -> (i32, i32) {
    %c0_i32 = arith.constant 0 : i32
    %c0_i32_0 = arith.constant 0 : i32
    return %arg0, %c0_i32 : i32, i32
  }
  func.func @transform_1(%arg0: i32) -> (i32, i32) {
    %c0_i32 = arith.constant 0 : i32
    %c0_i32_0 = arith.constant 0 : i32
    return %arg0, %c0_i32 : i32, i32
  }
}

</mosaic_0001>

<bundles_post_ra>
// kernel: tpu_custom_call.1
= control target key start
LH: loop header
LB: loop body
LE: loop exit
PB: predicated region body
PF: predicated region fallthrough
CT: control target
= control target key end

     0   :  { %6 = vsyncpa [#allocation3], 0  ;;  %s132_s0 = inlined_call_operand.hbm [shape: f32[16,128], index: 0, kind: input, shape index: {}]   ;;  %s133_s1 = inlined_call_operand.hbm [shape: f32[16,128], index: 1, kind: output, shape index: {}]  }
   0x1   :  { %7 = vsyncpa [#allocation4], 0  ;;  %s12_s8 = sshll.u32 %s132_s0, 4  ;;  %s112_s9 = smov [#allocation2]   ;;  %s13_s8 = int_to_ptr.hbm [resolvable:$true] %s12_s8 }
   0x2   :  { %s14_s10 = sshll.u32 %s112_s9, 4  ;;  %s113_s11 = smov 128   ;;  %s15_s10 = int_to_ptr.vmem [resolvable:$true] %s14_s10 }
   0x3   :  { %s114_s12 = smov 8  }
   0x4   :  { %20 = dma.hbm_to_vmem [thread:$0]  %s13_s8, 256, %s15_s10, [#allocation3], %s113_s11, %s113_s11, %s114_s12  }
   0x5   :  { %108 = dma.done.wait [#allocation3], 256  }
   0x6   :  { %109 = vsyncadd [#allocation3], 4294967040  ;;  %v25_v0 = vld [vmem:[#allocation2] sm:$0xff]  ;;  %v26_v1 = vld [vmem:[#allocation2 + $0x8] sm:$0xff]  ;;  %s115_s13 = smov [#allocation5]   ;;  %s41_s0 = sshll.u32 %s133_s1, 4  ;;  %s42_s0 = int_to_ptr.hbm [resolvable:$true] %s41_s0 }
   0x7   :  { %v54_v2 = vadd.f32 -1.0, %v25_v0  ;;  %v55_v3 = vadd.f32 -1.0, %v26_v1  ;;  %s39_s14 = sshll.u32 %s115_s13, 4  ;;  %s40_s14 = int_to_ptr.vmem [resolvable:$true] %s39_s14 }
   0x9   :  { %v29_v4 = vmul.f32 %v54_v2, %v54_v2  ;;  %v30_v5 = vmul.f32 %v55_v3, %v55_v3 }
   0xb   :  { %v31_v6 = vmul.f32 0.64, %v29_v4  ;;  %v32_v7 = vmul.f32 0.64, %v30_v5 }
   0xd   :  { %33 = vst [vmem:[#allocation5] sm:$0xff] %v31_v6 }
   0xe   :  { %34 = vst [vmem:[#allocation5 + $0x8] sm:$0xff] %v32_v7 }
   0xf   :  { %47 = dma.vmem_to_hbm [thread:$0]  %s40_s14, 256, %s42_s0, [#allocation4], %s113_s11, %s113_s11, %s114_s12  }
  0x10   :  { %110 = dma.done.wait [#allocation4], 256  }
  0x11   :  { %111 = vsyncadd [#allocation4], 4294967040 }
  0x12   :  { %52 = vsyncpa [#allocation3], 1 }
  0x13   :  { %53 = vsyncpa [#allocation4], 1 }

</bundles_post_ra>
